<compile_context>
chip_gen: v5e
topology: v5e:2x2
jax: 0.10.0
libtpu: 0.0.40
codegen_flags: <defaults>
</compile_context>

<pallas_src>
import jax
import jax.numpy as jnp
from jax import lax
from jax.experimental import pallas as pl
from jax.experimental.pallas import tpu as pltpu


def _round_up(x, m):
    return pl.cdiv(x, m) * m


def _head_kernel(x_ref, w_ref, b_ref, o_ref):
    # x_ref: [TB, H]  w_ref: [2, H] (PyTorch layout)  b_ref: [1, 2]  o_ref: [TB, 2]
    # dropout(p=0.2) in eval mode == identity, so the hot path is the matmul.
    # TODO(synk): training-mode stochastic dropout (pltpu.prng_*) not implemented;
    #             eval-mode (identity) semantics are reproduced here.
    x = x_ref[...]
    w = w_ref[...]
    # Contract along H for both operands (einsum 'bh,nh->bn'): keeps H on the
    # lane axis for the weight, so its VMEM tile is lane-dense.
    acc = lax.dot_general(
        x, w,
        dimension_numbers=(((1,), (1,)), ((), ())),
        preferred_element_type=jnp.float32,
    )
    o_ref[...] = (acc + b_ref[...].astype(jnp.float32)).astype(o_ref.dtype)


def _vmem_capacity_bytes():
    try:
        return int(pltpu.get_tpu_info().vmem_capacity_bytes)
    except Exception:
        return 64 * 1024 * 1024  # conservative (v7x per-TC) fallback


def _pick_tile_b(B, H, dtype, vmem_cap):
    """Pick a batch tile so one double-buffered features block stays well inside VMEM."""
    itemsize = jnp.dtype(dtype).itemsize
    # Budget for a SINGLE features buffer; BlockSpec double-buffers it (2x),
    # and the output / resident weight & bias buffers need headroom too.
    budget = min(vmem_cap // 16, 4 * 1024 * 1024)
    row_bytes = max(H * itemsize, 1)
    tile = max(1, budget // row_bytes)
    # Sublane alignment: 8 rows for 4-byte dtypes, 16 for 2-byte (bf16 packing).
    align = 8 if itemsize >= 4 else 16
    tile = max(align, (tile // align) * align)
    # No point making the tile larger than the (aligned) batch itself.
    tile = min(tile, _round_up(B, align))
    return int(tile), align


def binary_classification_head(features, out_w, out_b, *, tile_b=None):
    """features: [B, H]; out_w: [2, H] (PyTorch layout); out_b: [2]."""
    B, H = features.shape
    dtype = features.dtype
    itemsize = jnp.dtype(dtype).itemsize
    vmem_cap = _vmem_capacity_bytes()

    auto_tile, align = _pick_tile_b(B, H, dtype, vmem_cap)
    if tile_b is None:
        tile_b = auto_tile
    tile_b = int(max(align, _round_up(tile_b, align)))

    # Ragged batch: pad B up to a tile multiple (zero rows), slice output back.
    B_pad = int(_round_up(B, tile_b))
    if B_pad != B:
        features = jnp.pad(features, ((0, B_pad - B), (0, 0)))
    grid = (B_pad // tile_b,)

    b2d = out_b.reshape(1, 2)

    # VMEM limit sized to the chosen tiles (padded to (8,128) layout), with margin.
    H_pad = int(_round_up(H, 128))
    tb_pad = int(_round_up(tile_b, 8))
    feat_buf = tb_pad * H_pad * itemsize
    w_buf = 8 * H_pad * jnp.dtype(out_w.dtype).itemsize
    b_buf = 8 * 128 * jnp.dtype(out_b.dtype).itemsize
    o_buf = tb_pad * 128 * itemsize
    needed = 2 * (feat_buf + w_buf + b_buf + o_buf)
    vmem_limit = int(min(int(0.9 * vmem_cap),
                         max(2 * needed, 32 * 1024 * 1024)))

    # Memory-bound cost hint: ~2 FLOPs per feature byte streamed from HBM.
    cost = pl.CostEstimate(
        flops=2 * B_pad * H * 2,
        transcendentals=0,
        bytes_accessed=(B_pad * H * itemsize
                        + 2 * H * jnp.dtype(out_w.dtype).itemsize
                        + 2 * jnp.dtype(out_b.dtype).itemsize
                        + B_pad * 2 * itemsize),
    )

    out = pl.pallas_call(
        _head_kernel,
        out_shape=jax.ShapeDtypeStruct((B_pad, 2), dtype),
        grid_spec=pltpu.PrefetchScalarGridSpec(
            num_scalar_prefetch=0,
            grid=grid,
            in_specs=[
                # Streamed features tile (the only per-step DMA that matters).
                pl.BlockSpec((tile_b, H), lambda i: (i, 0)),
                # Invariant operands: constant index_map -> kept resident.
                pl.BlockSpec((2, H), lambda i: (0, 0)),
                pl.BlockSpec((1, 2), lambda i: (0, 0)),
            ],
            out_specs=pl.BlockSpec((tile_b, 2), lambda i: (i, 0)),
        ),
        compiler_params=pltpu.CompilerParams(
            # Batch axis is independent -> shards across both TCs on v7x when
            # the grid has >= 2 steps (neutral on single-TC v5e/v6e).
            dimension_semantics=("parallel",),
            vmem_limit_bytes=vmem_limit,
        ),
        cost_estimate=cost,
    )(features, out_w, b2d)

    return out[:B] if B_pad != B else out


def _reference(features, out_w, out_b):
    return features @ out_w.T + out_b


if __name__ == "__main__":
    key = jax.random.PRNGKey(0)
    B, H = 8, 32  # batch=8, input_size(hidden)=32

    k_feat, k_dw, k_db, k_ow, k_ob = jax.random.split(key, 5)

    features = jax.random.normal(k_feat, (B, H), dtype=jnp.float32)

    # Parameters initialized deterministically (PyTorch-Linear-style uniform bounds).
    # dense layer exists in __init__ but is unused in forward; created for shape fidelity.
    bound_dense = 1.0 / (H ** 0.5)
    dense_w = jax.random.uniform(k_dw, (H, H), minval=-bound_dense, maxval=bound_dense)
    dense_b = jax.random.uniform(k_db, (H,), minval=-bound_dense, maxval=bound_dense)
    del dense_w, dense_b  # not used in forward

    bound_out = 1.0 / (H ** 0.5)
    out_w = jax.random.uniform(k_ow, (2, H), minval=-bound_out, maxval=bound_out,
                               dtype=jnp.float32)
    out_b = jax.random.uniform(k_ob, (2,), minval=-bound_out, maxval=bound_out,
                               dtype=jnp.float32)

    out = binary_classification_head(features, out_w, out_b)
    out = jax.block_until_ready(out)

    ref = _reference(features, out_w, out_b)
    assert out.shape == (B, 2)
    assert jnp.allclose(out, ref, atol=1e-5, rtol=1e-5)

    # Ragged-batch path: B not a multiple of the tile -> pad + slice.
    B2 = 13
    feats2 = jax.random.normal(jax.random.PRNGKey(1), (B2, H), dtype=jnp.float32)
    out2 = jax.block_until_ready(
        binary_classification_head(feats2, out_w, out_b, tile_b=8))
    ref2 = _reference(feats2, out_w, out_b)
    assert out2.shape == (B2, 2)
    assert jnp.allclose(out2, ref2, atol=1e-5, rtol=1e-5)

    print("KERNEL_OK")
</pallas_src>

<mosaic_0001>
module attributes {stable_mosaic.version = 11 : i64} {
  func.func @_head_kernel(%arg0: i32, %arg1: memref<8x32xf32, #tpu.memory_space<vmem>>, %arg2: memref<2x32xf32, #tpu.memory_space<vmem>>, %arg3: memref<1x2xf32, #tpu.memory_space<vmem>>, %arg4: memref<8x2xf32, #tpu.memory_space<vmem>>) attributes {dimension_semantics = [#tpu.dimension_semantics<parallel>], iteration_bounds = array<i64: 1>, scalar_prefetch = 0 : i64, scratch_operands = 0 : i64, tpu.core_type = #tpu.core_type<tc>, window_params = [{transform_indices = @transform_0, window_bounds = array<i64: 8, 32>}, {pipeline_mode = #tpu.pipeline_mode<synchronous>, transform_indices = @transform_1, window_bounds = array<i64: 2, 32>}, {pipeline_mode = #tpu.pipeline_mode<synchronous>, transform_indices = @transform_2, window_bounds = array<i64: 1, 2>}, {transform_indices = @transform_3, window_bounds = array<i64: 8, 2>}]} {
    %c0 = arith.constant 0 : index
    %c0_0 = arith.constant 0 : index
    %0 = vector.load %arg1[%c0, %c0_0] : memref<8x32xf32, #tpu.memory_space<vmem>>, vector<8x32xf32>
    %c0_1 = arith.constant 0 : index
    %c0_2 = arith.constant 0 : index
    %1 = vector.load %arg2[%c0_1, %c0_2] : memref<2x32xf32, #tpu.memory_space<vmem>>, vector<2x32xf32>
    %cst = arith.constant dense<0.000000e+00> : vector<8x2xf32>
    %2 = tpu.matmul %0, %1, %cst {dimension_numbers = #tpu.dot_dimension_numbers<[1], [1], [0], [0], [0, 0, 1, 0], [], []>} : vector<8x32xf32>, vector<2x32xf32>, vector<8x2xf32> -> vector<8x2xf32>
    %c0_3 = arith.constant 0 : index
    %c0_4 = arith.constant 0 : index
    %3 = vector.load %arg3[%c0_3, %c0_4] : memref<1x2xf32, #tpu.memory_space<vmem>>, vector<1x2xf32>
    %4 = vector.broadcast %3 : vector<1x2xf32> to vector<8x2xf32>
    %5 = arith.addf %2, %4 : vector<8x2xf32>
    %c0_5 = arith.constant 0 : index
    %c0_6 = arith.constant 0 : index
    %6 = vector.load %arg4[%c0_5, %c0_6] : memref<8x2xf32, #tpu.memory_space<vmem>>, vector<8x2xf32>
    tpu.vector_store %arg4[%c0_5, %c0_6], %5 {strides = array<i32>} : memref<8x2xf32, #tpu.memory_space<vmem>>, vector<8x2xf32>,
    return
  }
  func.func @transform_0(%arg0: i32) -> (i32, i32) {
    %c0_i32 = arith.constant 0 : i32
    %c0_i32_0 = arith.constant 0 : i32
    return %arg0, %c0_i32 : i32, i32
  }
  func.func @transform_1(%arg0: i32) -> (i32, i32) {
    %c0_i32 = arith.constant 0 : i32
    %c0_i32_0 = arith.constant 0 : i32
    %c0_i32_1 = arith.constant 0 : i32
    return %c0_i32, %c0_i32_0 : i32, i32
  }
  func.func @transform_2(%arg0: i32) -> (i32, i32) {
    %c0_i32 = arith.constant 0 : i32
    %c0_i32_0 = arith.constant 0 : i32
    %c0_i32_1 = arith.constant 0 : i32
    return %c0_i32, %c0_i32_0 : i32, i32
  }
  func.func @transform_3(%arg0: i32) -> (i32, i32) {
    %c0_i32 = arith.constant 0 : i32
    %c0_i32_0 = arith.constant 0 : i32
    return %arg0, %c0_i32 : i32, i32
  }
}

</mosaic_0001>

<bundles_post_ra>
// kernel: tpu_custom_call.1
= control target key start
LH: loop header
LB: loop body
LE: loop exit
PB: predicated region body
PF: predicated region fallthrough
CT: control target
= control target key end

     0   :  { %8 = vsyncpa [#allocation3], 0  ;;  %s174_s0 = inlined_call_operand.hbm [shape: f32[8,32], index: 0, kind: input, shape index: {}]   ;;  %s175_s1 = inlined_call_operand.hbm [shape: f32[2,32], index: 1, kind: input, shape index: {}]   ;;  %s176_s2 = inlined_call_operand.vmem [shape: f32[1,2], index: 2, kind: input, shape index: {}]   ;;  %s177_s3 = inlined_call_operand.vmem [shape: f32[8,2], index: 3, kind: output, shape index: {}]  }
   0x1   :  { %s15_s14 = sshll.u32 %s174_s0, 4  ;;  %s16_s14 = int_to_ptr.hbm [resolvable:$true] %s15_s14 }
   0x2   :  { %9 = vsyncpa [#allocation5], 0  ;;  %s140_s15 = smov [#allocation2]   ;;  %s26_s19 = sshll.u32 %s175_s1, 4  ;;  %s27_s19 = int_to_ptr.hbm [resolvable:$true] %s26_s19 }
   0x3   :  { %s17_s16 = sshll.u32 %s140_s15, 4  ;;  %s141_s20 = smov [#allocation4]   ;;  %s18_s16 = int_to_ptr.vmem [resolvable:$true] %s17_s16 }
   0x4   :  { %20 = dma.hbm_to_vmem [thread:$0]  %s16_s14, 128, %s18_s16, [#allocation3]  }
   0x5   :  { %s28_s21 = sshll.u32 %s141_s20, 4  ;;  %s29_s21 = int_to_ptr.vmem [resolvable:$true] %s28_s21 }
   0x6   :  { %31 = dma.hbm_to_vmem [thread:$0]  %s27_s19, 32, %s29_s21, [#allocation5]  }
   0x7   :  { %136 = dma.done.wait [#allocation3], 128  }
   0x8   :  { %137 = vsyncadd [#allocation3], 4294967168 }
   0x9   :  { %138 = dma.done.wait [#allocation5], 32  }
   0xa   :  { %139 = vsyncadd [#allocation5], 4294967264  ;;  %vm48_vm0 = vcmask 261120   ;;  %v43_v0 = vld [vmem:[#allocation4] sm:$0x3]  ;;  %v42_v1 = vld [vmem:[#allocation2] sm:$0xff] }
   0xb   :  { %83 = vmatpush.xpose.msk.msra.mxu0 %vm48_vm0, %v43_v0  ;;  %v87_v2 = vld [vmem:[%s176_s2] ss:$0 sm:$0xff]  ;;  %vm75_vm1 = vcmask 15360  }
   0xe   :  { %84 = vmatmul.msk.f32.vlgmr.msra.gmra.mxu0 %vm48_vm0, %v42_v1 }
  0x8b   :  { %v72_v3 = vpop.f32.mrf.mxu0 }
  0x8c   :  { %v73_v4 = vadd.f32 %v87_v2, %v72_v3 }
  0x8e   :  { %76 = vst.msk [vmem:[%s177_s3] sm:$0xff] %vm75_vm1, %v73_v4 }
  0x8f   :  { %81 = vsyncpa [#allocation3], 1 }
  0x90   :  { %82 = vsyncpa [#allocation5], 1 }

</bundles_post_ra>
